<compile_context>
chip_gen: v7x
topology: tpu7x:2x2x1
jax: 0.10.0
libtpu: 0.0.40
codegen_flags: <defaults>
</compile_context>

<pallas_src>
import functools

import numpy as np
import jax
import jax.numpy as jnp
from jax.experimental import pallas as pl
from jax.experimental.pallas import tpu as pltpu


def _round_up(x: int, m: int) -> int:
    return ((x + m - 1) // m) * m


def _cdiv(a: int, b: int) -> int:
    return -(-a // b)


def _sublane_multiple(dtype) -> int:
    # Sub-32-bit dtypes pack along sublanes: bf16 vreg is (16,128), int8 (32,128).
    return {4: 8, 2: 16, 1: 32}.get(jnp.dtype(dtype).itemsize, 8)


def _vmem_budget_bytes() -> int:
    """64 MiB scoped limit on 128-MiB-VMEM chips (v5e/v6e), 32 MiB on v7x/unknown."""
    try:
        cap = pltpu.get_tpu_info().vmem_capacity_bytes
    except Exception:
        cap = 64 * 1024 * 1024  # unknown -> assume the small (v7x-like) VMEM
    return (64 if cap >= 128 * 1024 * 1024 else 32) * 1024 * 1024


# ----------------------------- streaming kernel ------------------------------

def _hinge_stream_kernel(targets_ref, inputs_ref, margin_ref, out_ref, *, scale):
    x = inputs_ref[...]                      # (tb, tc) logits tile
    t = targets_ref[...]                     # (tb, 1)  int32 global class ids
    m = margin_ref[...]                      # (1, tc)  f32 margins tile
    tb, tc = x.shape
    col = pl.program_id(1) * tc + jax.lax.broadcasted_iota(jnp.int32, (tb, tc), 1)
    hot = col == t                           # one-hot of the target column
    if scale == 1.0:                         # static branch: skip the VALU multiply
        out = jnp.where(hot, x - m, x)
    else:                                    # fold the scale: x*s, subtract m*s at hot lanes
        s = jnp.float32(scale)
        xs = x * s
        out = jnp.where(hot, xs - m * s, xs)
    out_ref[...] = out.astype(out_ref.dtype)


def _hinge_stream(inputs, targets2d, margins2d, scale, *, block_b, block_c, vmem_budget):
    B, C = inputs.shape
    sub = _sublane_multiple(inputs.dtype)
    row_cap = 1024 if vmem_budget >= 64 * 1024 * 1024 else 512

    # ---- Tile selection: lane-dense blocks on a cdiv grid (no pad/slice; the
    # ragged trailing blocks are load-padded / store-masked by Pallas). ----
    tc_cap = max(128, _round_up(block_c, 128))
    tc = C if C <= tc_cap else tc_cap        # full-dim block or 128-multiple
    if block_b is not None:
        tb_cap = _round_up(max(int(block_b), sub), sub)
    else:
        tb_cap = _round_up(max(sub, min(row_cap, (row_cap * 2048) // max(tc, 128))), sub)
    if B <= tb_cap:
        tb = B                               # single full-dim row block
    else:                                    # split B evenly into aligned tiles
        tb = _round_up(_cdiv(B, _cdiv(B, tb_cap)), sub)

    # v7x: guarantee >= 2 grid blocks so the "parallel" axes can be sharded
    # across both TensorCores (no effect on single-TC v5e/v6e).
    if _cdiv(B, tb) * _cdiv(C, tc) == 1:
        if B >= 2 * sub:
            tb = _round_up(_cdiv(B, 2), sub)
        elif C >= 256:
            tc = _round_up(_cdiv(C, 2), 128)

    grid = (_cdiv(B, tb), _cdiv(C, tc))
    itemsize = jnp.dtype(inputs.dtype).itemsize
    cost = pl.CostEstimate(
        flops=3 * B * C,
        transcendentals=0,
        bytes_accessed=2 * B * C * itemsize + B * 4 + C * 4,
    )

    return pl.pallas_call(
        functools.partial(_hinge_stream_kernel, scale=float(scale)),
        out_shape=jax.ShapeDtypeStruct((B, C), inputs.dtype),
        grid_spec=pltpu.PrefetchScalarGridSpec(
            num_scalar_prefetch=0,
            grid=grid,
            in_specs=[
                pl.BlockSpec((tb, 1), lambda i, j: (i, 0)),     # targets (per-row)
                pl.BlockSpec((tb, tc), lambda i, j: (i, j)),    # inputs tile
                pl.BlockSpec((1, tc), lambda i, j: (0, j)),     # margins (row-shared)
            ],
            out_specs=pl.BlockSpec((tb, tc), lambda i, j: (i, j)),
        ),
        compiler_params=pltpu.CompilerParams(
            dimension_semantics=("parallel", "parallel"),
            vmem_limit_bytes=vmem_budget,
        ),
        cost_estimate=cost,
    )(targets2d, inputs, margins2d)


# ------------------------- scale == 1.0 scatter kernel -----------------------

def _hinge_scatter_kernel(targets_ref, in_ref, m_ref, out_ref):
    # Blocks are the single (1, 1, 128) lane block holding column targets[row].
    t = targets_ref[pl.program_id(0)]                      # SMEM scalar read
    lane = jax.lax.broadcasted_iota(jnp.int32, in_ref.shape, 2)
    hot = lane == (t % 128)
    x = in_ref[...]
    out_ref[...] = jnp.where(hot, (x - m_ref[...]).astype(out_ref.dtype), x)


def _hinge_scatter(inputs, targets, margins, vmem_budget):
    B, C = inputs.shape
    # Unit middle dim makes the (1, 128) lane block unambiguously legal
    # (second-to-last block dim equals the full array dim); reshape is a bitcast.
    x3 = inputs.reshape(B, 1, C)
    m3 = margins.reshape(1, 1, C)
    itemsize = jnp.dtype(inputs.dtype).itemsize
    cost = pl.CostEstimate(
        flops=2 * B * 128,
        transcendentals=0,
        bytes_accessed=B * (2 * 128 * itemsize + 128 * 4 + 4),
    )

    out = pl.pallas_call(
        _hinge_scatter_kernel,
        out_shape=jax.ShapeDtypeStruct((B, 1, C), inputs.dtype),
        grid_spec=pltpu.PrefetchScalarGridSpec(
            num_scalar_prefetch=1,                   # targets -> SMEM, drives index_maps
            grid=(B,),
            in_specs=[
                pl.BlockSpec((1, 1, 128), lambda i, t: (i, 0, t[i] // 128)),  # inputs
                pl.BlockSpec((1, 1, 128), lambda i, t: (0, 0, t[i] // 128)),  # margins
            ],
            out_specs=pl.BlockSpec((1, 1, 128), lambda i, t: (i, 0, t[i] // 128)),
        ),
        compiler_params=pltpu.CompilerParams(
            dimension_semantics=("parallel",),
            vmem_limit_bytes=vmem_budget,
        ),
        cost_estimate=cost,
        # Inputs (operand index 1; the scalar-prefetch targets are operand 0) alias
        # the output, so columns we never touch never move through HBM.
        input_output_aliases={1: 0},
    )(targets, x3, m3)
    return out.reshape(B, C)


# ---------------------------------- wrapper ----------------------------------

def hinge_linear(inputs, targets, margin_list, *, max_margin=0.5, scale=1.0,
                 training=True, block_b=None, block_c=2048, scatter=None):
    """
    inputs:      [B, C] float logits
    targets:     [B]    int class indices
    margin_list: [C]    raw per-class margins (rescaled so their max == max_margin)
    scatter:     None = auto, True/False forces the scale==1 scatter / streaming path.
    """
    if not training or targets is None:
        return inputs

    B, C = inputs.shape
    # Match PyTorch __init__: rescale margins so their max equals max_margin.
    # (Like the reference, assumes max(margin_list) > 0.)
    margins = margin_list.astype(jnp.float32)
    margins = margins * (max_margin / jnp.max(margins))

    vmem_budget = _vmem_budget_bytes()
    t32 = targets.astype(jnp.int32)

    # scale == 1.0: only one element per row changes -> O(B) scatter kernel.
    # Auto-dispatch only for larger class counts where the HBM saving clearly
    # beats the ~0.35us/row grid-step overhead.
    use_scatter = scatter if scatter is not None else (scale == 1.0 and C >= 1024)
    if use_scatter and scale == 1.0 and C >= 128:
        return _hinge_scatter(inputs, t32, margins, vmem_budget)

    return _hinge_stream(inputs, t32.reshape(B, 1), margins.reshape(1, C), scale,
                         block_b=block_b, block_c=block_c, vmem_budget=vmem_budget)


# --------------------------------- reference ----------------------------------

def hinge_linear_ref(inputs, targets, margin_list, *, max_margin=0.5, scale=1.0):
    C = inputs.shape[1]
    margins = margin_list.astype(jnp.float32)
    margins = margins * (max_margin / jnp.max(margins))
    one_hot = jax.nn.one_hot(targets, C, dtype=jnp.float32)
    batch_margin = jnp.sum(margins[None, :] * one_hot, axis=-1, keepdims=True)
    x = inputs.astype(jnp.float32)
    out = jnp.where(one_hot > 0, x - batch_margin, x) * scale
    return out.astype(inputs.dtype)


if __name__ == "__main__":
    key = jax.random.PRNGKey(0)
    k1, k2, k3, k4, k5 = jax.random.split(key, 5)

    # Case 1: aligned shapes, scale != 1 -> streaming kernel.
    B, C = 8, 128
    x1 = jax.random.normal(k1, (B, C), dtype=jnp.float32)
    t1 = jax.random.randint(k2, (B,), 0, C, dtype=jnp.int32)
    m1 = jnp.linspace(0.1, 1.0, C, dtype=jnp.float32)
    out1 = jax.block_until_ready(hinge_linear(x1, t1, m1, max_margin=0.5, scale=2.0))
    ref1 = hinge_linear_ref(x1, t1, m1, max_margin=0.5, scale=2.0)
    np.testing.assert_allclose(np.asarray(out1), np.asarray(ref1), rtol=1e-6, atol=1e-6)

    # Case 2: unaligned B and C -> streaming kernel with ragged (masked) edge
    # blocks; no wrapper pad/slice any more.
    B2, C2 = 6, 200
    x2 = jax.random.normal(k3, (B2, C2), dtype=jnp.float32)
    t2 = jax.random.randint(k4, (B2,), 0, C2, dtype=jnp.int32)
    m2 = jnp.linspace(0.2, 0.9, C2, dtype=jnp.float32)
    out2 = jax.block_until_ready(hinge_linear(x2, t2, m2, scale=1.0))
    ref2 = hinge_linear_ref(x2, t2, m2, scale=1.0)
    np.testing.assert_allclose(np.asarray(out2), np.asarray(ref2), rtol=1e-6, atol=1e-6)

    # Case 3: scale == 1 scatter path (forced at small C), with targets in the
    # first, middle and ragged last 128-lane class blocks.
    B3, C3 = 8, 320
    x3 = jax.random.normal(k5, (B3, C3), dtype=jnp.float32)
    t3 = jnp.array([0, 5, 127, 128, 200, 255, 300, 319], dtype=jnp.int32)
    m3 = jnp.linspace(0.05, 0.8, C3, dtype=jnp.float32)
    out3 = jax.block_until_ready(hinge_linear(x3, t3, m3, scale=1.0, scatter=True))
    ref3 = hinge_linear_ref(x3, t3, m3, scale=1.0)
    np.testing.assert_allclose(np.asarray(out3), np.asarray(ref3), rtol=1e-6, atol=1e-6)

    # Case 4: bf16 inputs exercise the dtype-native (16-row) sublane packing.
    x4 = x1.astype(jnp.bfloat16)
    out4 = jax.block_until_ready(hinge_linear(x4, t1, m1, scale=2.0))
    ref4 = hinge_linear_ref(x4, t1, m1, scale=2.0)
    np.testing.assert_allclose(np.asarray(out4, dtype=np.float32),
                               np.asarray(ref4, dtype=np.float32), rtol=1e-2, atol=1e-2)

    # Eval mode / no targets -> identity.
    out_eval = hinge_linear(x1, t1, m1, training=False)
    np.testing.assert_allclose(np.asarray(out_eval), np.asarray(x1))

    print("KERNEL_OK")
</pallas_src>

<mosaic_0001>
module attributes {stable_mosaic.version = 11 : i64} {
  func.func @_hinge_stream_kernel(%arg0: i32, %arg1: i32, %arg2: memref<8x1xi32, #tpu.memory_space<vmem>>, %arg3: memref<8x128xf32, #tpu.memory_space<vmem>>, %arg4: memref<1x128xf32, #tpu.memory_space<vmem>>, %arg5: memref<8x128xf32, #tpu.memory_space<vmem>>) attributes {dimension_semantics = [#tpu.dimension_semantics<parallel>, #tpu.dimension_semantics<parallel>], iteration_bounds = array<i64: 1, 1>, scalar_prefetch = 0 : i64, scratch_operands = 0 : i64, tpu.core_type = #tpu.core_type<tc>, window_params = [{transform_indices = @transform_0, window_bounds = array<i64: 8, 1>}, {transform_indices = @transform_1, window_bounds = array<i64: 8, 128>}, {transform_indices = @transform_2, window_bounds = array<i64: 1, 128>}, {transform_indices = @transform_3, window_bounds = array<i64: 8, 128>}]} {
    %c0 = arith.constant 0 : index
    %c0_0 = arith.constant 0 : index
    %0 = vector.load %arg3[%c0, %c0_0] : memref<8x128xf32, #tpu.memory_space<vmem>>, vector<8x128xf32>
    %c0_1 = arith.constant 0 : index
    %c0_2 = arith.constant 0 : index
    %1 = vector.load %arg2[%c0_1, %c0_2] : memref<8x1xi32, #tpu.memory_space<vmem>>, vector<8x1xi32>
    %c0_3 = arith.constant 0 : index
    %c0_4 = arith.constant 0 : index
    %2 = vector.load %arg4[%c0_3, %c0_4] : memref<1x128xf32, #tpu.memory_space<vmem>>, vector<1x128xf32>
    %c128_i32 = arith.constant 128 : i32
    %3 = arith.muli %arg1, %c128_i32 : i32
    %4 = tpu.iota {dimensions = array<i32: 1>} : vector<8x128xi32>
    %5 = vector.broadcast %3 : i32 to vector<8x128xi32>
    %6 = arith.addi %5, %4 : vector<8x128xi32>
    %7 = vector.broadcast %1 : vector<8x1xi32> to vector<8x128xi32>
    %8 = arith.cmpi eq, %6, %7 : vector<8x128xi32>
    %cst = arith.constant 2.000000e+00 : f32
    %9 = vector.broadcast %cst : f32 to vector<8x128xf32>
    %10 = arith.mulf %0, %9 : vector<8x128xf32>
    %cst_5 = arith.constant 2.000000e+00 : f32
    %11 = vector.broadcast %cst_5 : f32 to vector<1x128xf32>
    %12 = arith.mulf %2, %11 : vector<1x128xf32>
    %13 = vector.broadcast %12 : vector<1x128xf32> to vector<8x128xf32>
    %14 = arith.subf %10, %13 : vector<8x128xf32>
    %15 = arith.select %8, %14, %10 : vector<8x128xi1>, vector<8x128xf32>
    %c0_6 = arith.constant 0 : index
    %c0_7 = arith.constant 0 : index
    %16 = vector.load %arg5[%c0_6, %c0_7] : memref<8x128xf32, #tpu.memory_space<vmem>>, vector<8x128xf32>
    tpu.vector_store %arg5[%c0_6, %c0_7], %15 {strides = array<i32>} : memref<8x128xf32, #tpu.memory_space<vmem>>, vector<8x128xf32>,
    return
  }
  func.func @transform_0(%arg0: i32, %arg1: i32) -> (i32, i32) {
    %c0_i32 = arith.constant 0 : i32
    %c0_i32_0 = arith.constant 0 : i32
    return %arg0, %c0_i32 : i32, i32
  }
  func.func @transform_1(%arg0: i32, %arg1: i32) -> (i32, i32) {
    %c0_i32 = arith.constant 0 : i32
    return %arg0, %arg1 : i32, i32
  }
  func.func @transform_2(%arg0: i32, %arg1: i32) -> (i32, i32) {
    %c0_i32 = arith.constant 0 : i32
    %c0_i32_0 = arith.constant 0 : i32
    return %c0_i32, %arg1 : i32, i32
  }
  func.func @transform_3(%arg0: i32, %arg1: i32) -> (i32, i32) {
    %c0_i32 = arith.constant 0 : i32
    return %arg0, %arg1 : i32, i32
  }
}

</mosaic_0001>

<bundles_post_ra>
// kernel: tpu_custom_call.1
= control target key start
LH: loop header
LB: loop body
LE: loop exit
PB: predicated region body
PF: predicated region fallthrough
CT: control target
= control target key end

     0   :  { %s122_s0 = inlined_call_operand.vmem [shape: s32[8,1], index: 0, kind: input, shape index: {}]   ;;  %s123_s1 = inlined_call_operand.vmem [shape: f32[8,128], index: 1, kind: input, shape index: {}]   ;;  %s124_s2 = inlined_call_operand.vmem [shape: f32[1,128], index: 2, kind: input, shape index: {}]   ;;  %s125_s3 = inlined_call_operand.hbm [shape: f32[8,128], index: 3, kind: output, shape index: {}]  }
   0x1   :  { %v16_v0 = vld [vmem:[%s122_s0] sm:$0xff] }
   0x2   :  { %8 = vsyncpa [#allocation3], 0  ;;  %v79_v1 = vmov 0   ;;  %v19_v2 = vlaneseq  ;;  %v17_v4 = vld [vmem:[%s124_s2] sm:$0x1]  ;;  %s80_s0 = smov [#allocation2]  }
   0x3   :  { %54 = vset.pattern.permute.xlu0 %v79_v1  ;;  %v28_v6 = vmul.f32 2.0, %v17_v4  ;;  %v15_v7 = vld [vmem:[%s123_s1] sm:$0xff]  ;;  %s44_s18 = sshll.u32 %s80_s0, 4  ;;  %s45_s18 = int_to_ptr.vmem [resolvable:$true] %s44_s18 }
   0x4   :  { %24 = vperm.xlu0 %54, %v16_v0   ;;  %v31_v3 = vshrl.u32 %v19_v2, 7  ;;  %v27_v8 = vmul.f32 2.0, %v15_v7  ;;  %v20_v10 = vand.u32 127, %v19_v2  ;;  %s55_s19 = scalar_lea.vmem %s45_s18, 128  ;;  %p60_p1 = scmp.lt.s32.totalorder %s45_s18, %s45_s18 }
   0x5   :  { %p56_p0 = scmp.ne.s32.totalorder %s45_s18, %s55_s19  ;;  %p61_p2 = scmp.lt.s32.totalorder %s55_s19, %s55_s19 }
   0x6   :  { %v32_v5 = vsub.s32 0, %v31_v3 }
   0x7   :  { %p62_p3 = por %p61_p2, %p60_p1 }
   0x8   :  { %v33_v9 = vrot.slane %v28_v6, %v32_v5 }
   0x9   :  { %p63_p4 = pnand %p62_p3, %p56_p0 }
   0xa   :  { %v35_v11 = vsub.f32 %v27_v8, %v33_v9 }
  0x83   :  { %v25_v12 = vpop.permute.xlu0 %24 }
  0x84   :  { %vm26_vm0 = vcmp.eq.s32.totalorder %v20_v10, %v25_v12 }
  0x85   :  { %v36_v13 = vsel %vm26_vm0, %v35_v11, %v27_v8 }
  0x86   :  { %37 = vst [vmem:[#allocation2] sm:$0xff] %v36_v13 }
  0x87   :  { %66 = shalt.err (!%p63_p4)
}
  0x88   :  { %s67_s20 = scalar_lea.hbm %s125_s3, 128 }
  0x89   :  { %p68_p5 = scmp.ne.s32.totalorder %s125_s3, %s67_s20  ;;  %p71_p6 = scmp.lt.u32.totalorder %s67_s20, %s125_s3 }
  0x8b   :  { %p73_p7 = pnand %p71_p6, %p68_p5 }
  0x8d   :  { %76 = shalt.err (!%p73_p7)
}
  0x8e   :  { %47 = dma.vmem_to_hbm [thread:$0]  %s45_s18, 128, %s125_s3, [#allocation3]  }
  0x8f   :  { %77 = dma.done.wait [#allocation3], 128  }
  0x90   :  { %78 = vsyncadd [#allocation3], 4294967168 }
  0x91   :  { %51 = vsyncpa [#allocation3], 1 }

</bundles_post_ra>
